<compile_context>
chip_gen: v7x
topology: tpu7x:2x2x1
jax: 0.10.0
libtpu: 0.0.40
codegen_flags: <defaults>
</compile_context>

<pallas_src>
import jax
import jax.numpy as jnp
from jax.experimental import pallas as pl
from jax.experimental.pallas import tpu as pltpu


def _round_up(x, m):
    return (x + m - 1) // m * m


def _mlp_kernel(x_ref, w1_ref, b1_ref, w2_ref, b2_ref, o_ref):
    # fc1 on the MXU: (hidden, in) @ (in, TB) -> (hidden, TB), f32 accumulate.
    h = jnp.dot(w1_ref[...], x_ref[...], preferred_element_type=jnp.float32)
    # bias + sigmoid (EUP path); b1 is a (hidden, 1) column broadcast over lanes.
    h = jax.nn.sigmoid(h + b1_ref[...])
    # fc2 (hidden -> 1) on VPU + XLU: elementwise multiply by the (hidden, 1)
    # w2 column, then a sublane reduction.  Result is a lane-dense (1, TB) row.
    out = jnp.sum(h * w2_ref[...], axis=0, keepdims=True) + b2_ref[0, 0]
    o_ref[...] = out.astype(o_ref.dtype)


def modelo_ventas_forward(x, w1, b1, w2, b2, *, block_b=512):
    """Pallas forward for ModeloVentas.

    x  : (B, input_size)        float32
    w1 : (hidden, input_size)   float32  (== torch fc1.weight)
    b1 : (hidden, 1)            float32  (== torch fc1.bias[:, None])
    w2 : (hidden, 1)            float32  (== torch fc2.weight.T)
    b2 : (1, 1)                 float32  (== torch fc2.bias[None, :])
    returns (B, 1) float32
    """
    B, in_size = x.shape
    hidden = w1.shape[0]

    # Lane-dense batch tile: multiple of 128 lanes, capped at block_b per step.
    tb = min(_round_up(max(block_b, 128), 128), _round_up(max(B, 1), 128))
    b_pad = _round_up(B, tb)
    grid = (b_pad // tb,)

    # Layout plumbing in the wrapper: pad the batch and put it on the lane axis.
    x_t = jnp.pad(x, ((0, b_pad - B), (0, 0))).T          # (in_size, b_pad)

    flops = 2 * b_pad * in_size * hidden + 2 * b_pad * hidden
    bytes_accessed = 4 * (x_t.size + w1.size + b1.size + w2.size + b2.size + b_pad)
    cost = pl.CostEstimate(flops=flops,
                           transcendentals=b_pad * hidden,
                           bytes_accessed=bytes_accessed)

    out_row = pl.pallas_call(
        _mlp_kernel,
        out_shape=jax.ShapeDtypeStruct((1, b_pad), jnp.float32),
        grid_spec=pltpu.PrefetchScalarGridSpec(
            num_scalar_prefetch=0,
            grid=grid,
            in_specs=[
                # batch tile i on the lane axis; weights stay resident (block (0,0)).
                pl.BlockSpec((in_size, tb), lambda i: (0, i)),
                pl.BlockSpec((hidden, in_size), lambda i: (0, 0)),
                pl.BlockSpec((hidden, 1), lambda i: (0, 0)),
                pl.BlockSpec((hidden, 1), lambda i: (0, 0)),
                # b2 is a scalar -> SMEM, no padded VMEM tile / extra DMA channel.
                pl.BlockSpec(memory_space=pltpu.MemorySpace.SMEM),
            ],
            out_specs=pl.BlockSpec((1, tb), lambda i: (0, i)),
        ),
        compiler_params=pltpu.CompilerParams(
            # Batch tiles are independent: shard across TCs on v7x (harmless on v5e/v6e).
            dimension_semantics=("parallel",)),
        cost_estimate=cost,
    )(x_t, w1, b1, w2, b2)

    return out_row[0, :B].reshape(B, 1)


def init_params(key, input_size, hidden_size):
    """Deterministic init mirroring torch.nn.Linear's U(-1/sqrt(fan_in), ...)."""
    k1, k2, k3, k4 = jax.random.split(key, 4)
    lim1 = 1.0 / (input_size ** 0.5)
    lim2 = 1.0 / (hidden_size ** 0.5)
    w1 = jax.random.uniform(k1, (hidden_size, input_size), jnp.float32, -lim1, lim1)
    b1 = jax.random.uniform(k2, (hidden_size, 1), jnp.float32, -lim1, lim1)
    w2 = jax.random.uniform(k3, (hidden_size, 1), jnp.float32, -lim2, lim2)
    b2 = jax.random.uniform(k4, (1, 1), jnp.float32, -lim2, lim2)
    return w1, b1, w2, b2


def _reference(x, w1, b1, w2, b2):
    # Same math as the torch module, in plain JAX.
    return jax.nn.sigmoid(x @ w1.T + b1.T) @ w2 + b2


if __name__ == "__main__":
    input_size = 8
    hidden_size = 32

    key = jax.random.PRNGKey(0)
    kx, kp, kx2 = jax.random.split(key, 3)
    w1, b1, w2, b2 = init_params(kp, input_size, hidden_size)

    # --- check 1: small batch (single grid step, padding path) ---
    batch = 8
    x = jax.random.normal(kx, (batch, input_size), jnp.float32)
    out = modelo_ventas_forward(x, w1, b1, w2, b2)
    jax.block_until_ready(out)
    ref = _reference(x, w1, b1, w2, b2)
    assert out.shape == (batch, 1)
    assert jnp.allclose(out, ref, atol=1e-5, rtol=1e-5)

    # --- check 2: larger batch with small tile -> multi-step grid ---
    batch2 = 300
    x2 = jax.random.normal(kx2, (batch2, input_size), jnp.float32)
    out2 = modelo_ventas_forward(x2, w1, b1, w2, b2, block_b=128)
    jax.block_until_ready(out2)
    ref2 = _reference(x2, w1, b1, w2, b2)
    assert out2.shape == (batch2, 1)
    assert jnp.allclose(out2, ref2, atol=1e-5, rtol=1e-5)

    print("KERNEL_OK")
</pallas_src>

<mosaic_0001>
module attributes {stable_mosaic.version = 11 : i64} {
  func.func @_mlp_kernel(%arg0: i32, %arg1: memref<8x128xf32, #tpu.memory_space<vmem>>, %arg2: memref<32x8xf32, #tpu.memory_space<vmem>>, %arg3: memref<32x1xf32, #tpu.memory_space<vmem>>, %arg4: memref<32x1xf32, #tpu.memory_space<vmem>>, %arg5: memref<1x1xf32, #tpu.memory_space<smem>>, %arg6: memref<1x128xf32, #tpu.memory_space<vmem>>) attributes {dimension_semantics = [#tpu.dimension_semantics<parallel>], iteration_bounds = array<i64: 1>, scalar_prefetch = 0 : i64, scratch_operands = 0 : i64, tpu.core_type = #tpu.core_type<tc>, window_params = [{transform_indices = @transform_0, window_bounds = array<i64: 8, 128>}, {pipeline_mode = #tpu.pipeline_mode<synchronous>, transform_indices = @transform_1, window_bounds = array<i64: 32, 8>}, {pipeline_mode = #tpu.pipeline_mode<synchronous>, transform_indices = @transform_2, window_bounds = array<i64: 32, 1>}, {pipeline_mode = #tpu.pipeline_mode<synchronous>, transform_indices = @transform_3, window_bounds = array<i64: 32, 1>}, {transform_indices = @transform_4, window_bounds = array<i64: 1, 1>}, {transform_indices = @transform_5, window_bounds = array<i64: 1, 128>}]} {
    %c0 = arith.constant 0 : index
    %c0_0 = arith.constant 0 : index
    %0 = vector.load %arg2[%c0, %c0_0] : memref<32x8xf32, #tpu.memory_space<vmem>>, vector<32x8xf32>
    %c0_1 = arith.constant 0 : index
    %c0_2 = arith.constant 0 : index
    %1 = vector.load %arg1[%c0_1, %c0_2] : memref<8x128xf32, #tpu.memory_space<vmem>>, vector<8x128xf32>
    %cst = arith.constant dense<0.000000e+00> : vector<32x128xf32>
    %2 = tpu.matmul %0, %1, %cst {dimension_numbers = #tpu.dot_dimension_numbers<[1], [0], [0], [1], [0, 0, 1, 1], [], []>} : vector<32x8xf32>, vector<8x128xf32>, vector<32x128xf32> -> vector<32x128xf32>
    %c0_3 = arith.constant 0 : index
    %c0_4 = arith.constant 0 : index
    %3 = vector.load %arg3[%c0_3, %c0_4] : memref<32x1xf32, #tpu.memory_space<vmem>>, vector<32x1xf32>
    %4 = vector.broadcast %3 : vector<32x1xf32> to vector<32x128xf32>
    %5 = arith.addf %2, %4 : vector<32x128xf32>
    %6 = arith.negf %5 : vector<32x128xf32>
    %7 = math.exp %6 : vector<32x128xf32>
    %cst_5 = arith.constant 1.000000e+00 : f32
    %8 = vector.broadcast %cst_5 : f32 to vector<32x128xf32>
    %9 = arith.addf %8, %7 : vector<32x128xf32>
    %10 = arith.divf %8, %9 : vector<32x128xf32>
    %c0_6 = arith.constant 0 : index
    %c0_7 = arith.constant 0 : index
    %11 = vector.load %arg4[%c0_6, %c0_7] : memref<32x1xf32, #tpu.memory_space<vmem>>, vector<32x1xf32>
    %12 = vector.broadcast %11 : vector<32x1xf32> to vector<32x128xf32>
    %13 = arith.mulf %10, %12 : vector<32x128xf32>
    %cst_8 = arith.constant dense<0.000000e+00> : vector<128xf32>
    %14 = vector.multi_reduction <add>, %13, %cst_8 [0] : vector<32x128xf32> to vector<128xf32>
    %15 = vector.shape_cast %14 : vector<128xf32> to vector<1x128xf32>
    %c0_9 = arith.constant 0 : index
    %c0_10 = arith.constant 0 : index
    %16 = memref.load %arg5[%c0_9, %c0_10] : memref<1x1xf32, #tpu.memory_space<smem>>
    %17 = vector.broadcast %16 : f32 to vector<1x128xf32>
    %18 = arith.addf %15, %17 : vector<1x128xf32>
    %c0_11 = arith.constant 0 : index
    %c0_12 = arith.constant 0 : index
    %19 = vector.load %arg6[%c0_11, %c0_12] : memref<1x128xf32, #tpu.memory_space<vmem>>, vector<1x128xf32>
    tpu.vector_store %arg6[%c0_11, %c0_12], %18 {strides = array<i32>} : memref<1x128xf32, #tpu.memory_space<vmem>>, vector<1x128xf32>,
    return
  }
  func.func @transform_0(%arg0: i32) -> (i32, i32) {
    %c0_i32 = arith.constant 0 : i32
    %c0_i32_0 = arith.constant 0 : i32
    return %c0_i32, %arg0 : i32, i32
  }
  func.func @transform_1(%arg0: i32) -> (i32, i32) {
    %c0_i32 = arith.constant 0 : i32
    %c0_i32_0 = arith.constant 0 : i32
    %c0_i32_1 = arith.constant 0 : i32
    return %c0_i32, %c0_i32_0 : i32, i32
  }
  func.func @transform_2(%arg0: i32) -> (i32, i32) {
    %c0_i32 = arith.constant 0 : i32
    %c0_i32_0 = arith.constant 0 : i32
    %c0_i32_1 = arith.constant 0 : i32
    return %c0_i32, %c0_i32_0 : i32, i32
  }
  func.func @transform_3(%arg0: i32) -> (i32, i32) {
    %c0_i32 = arith.constant 0 : i32
    %c0_i32_0 = arith.constant 0 : i32
    %c0_i32_1 = arith.constant 0 : i32
    return %c0_i32, %c0_i32_0 : i32, i32
  }
  func.func @transform_4(%arg0: i32) -> (i32, i32) {
    %c0_i32 = arith.constant 0 : i32
    %c0_i32_0 = arith.constant 0 : i32
    %c0_i32_1 = arith.constant 0 : i32
    return %c0_i32, %c0_i32_0 : i32, i32
  }
  func.func @transform_5(%arg0: i32) -> (i32, i32) {
    %c0_i32 = arith.constant 0 : i32
    %c0_i32_0 = arith.constant 0 : i32
    return %c0_i32, %arg0 : i32, i32
  }
}

</mosaic_0001>

<bundles_post_ra>
// kernel: tpu_custom_call.1
= control target key start
LH: loop header
LB: loop body
LE: loop exit
PB: predicated region body
PF: predicated region fallthrough
CT: control target
= control target key end

     0   :  { %vm51_vm0 = vcmask 64512   ;;  %s381_s0 = inlined_call_operand.vmem [shape: f32[8,128], index: 0, kind: input, shape index: {}]   ;;  %s382_s1 = inlined_call_operand.vmem [shape: f32[32,8], index: 1, kind: input, shape index: {}]   ;;  %s383_s2 = inlined_call_operand.vmem [shape: f32[32,1], index: 2, kind: input, shape index: {}]   ;;  %s384_s3 = inlined_call_operand.vmem [shape: f32[32,1], index: 3, kind: input, shape index: {}]   ;;  %s385_s4 = inlined_call_operand.<no memory space> [shape: f32[1,1], index: 4, kind: input, shape index: {}]   ;;  %s386_s5 = inlined_call_operand.hbm [shape: f32[1,128], index: 5, kind: output, shape index: {}]  }
   0x1   :  { %v26_v0 = vld [vmem:[%s381_s0] sm:$0xff]  ;;  %v24_v2 = vld [vmem:[%s382_s1 + $0x10] sm:$0xff]  ;;  %v23_v3 = vld [vmem:[%s382_s1 + $0x8] sm:$0xff] }
   0x2   :  { %v22_v1 = vld [vmem:[%s382_s1] sm:$0xff]  ;;  %241 = vmatprep.subr.mxu0 %v26_v0  ;;  %249 = vmatprep.subr.mxu1 %v26_v0  ;;  %v25_v4 = vld [vmem:[%s382_s1 + $0x18] sm:$0xff]  ;;  %v29_v6 = vld [vmem:[%s383_s2 + $0x10] sm:$0xff] }
   0x3   :  { %242 = vmatpush3.msra.mxu0 %v26_v0  ;;  %250 = vmatpush3.msra.mxu1 %v26_v0  ;;  %v27_v5 = vld [vmem:[%s383_s2] sm:$0xff] }
   0x4   :  { %243 = vmatprep.mubr.msk.f32.mxu0 %vm51_vm0, %v22_v1  ;;  %246 = vmatprep.mubr.msk.f32.mxu1 %vm51_vm0, %v24_v2 }
   0x5   :  { %244 = vmatmul.mubr.msk.f32.vlgmr.msra.gmra.mrb[0].mxu0 %vm51_vm0, %v23_v3  ;;  %247 = vmatmul.mubr.msk.f32.vlgmr.msra.gmra.mrb[0].mxu1 %vm51_vm0, %v25_v4 }
   0x6   :  { %11 = vsyncpa [#allocation4], 0  ;;  %v295_v7 = vmov 0   ;;  %v28_v8 = vld [vmem:[%s383_s2 + $0x8] sm:$0xff]  ;;  %v30_v9 = vld [vmem:[%s383_s2 + $0x18] sm:$0xff]  ;;  %v211_v58 = vstv %s385_s4  ;;  %s296_s17 = smov [#allocation3]  }
   0x7   :  { %253 = vset.pattern.permute.xlu0 %v295_v7  ;;  %254 = vset.pattern.permute.xlu1 %v295_v7  ;;  %v173_v10 = vld [vmem:[%s384_s3] sm:$0xff]  ;;  %v174_v11 = vld [vmem:[%s384_s3 + $0x8] sm:$0xff]  ;;  %v175_v12 = vld [vmem:[%s384_s3 + $0x10] sm:$0xff]  ;;  %s220_s18 = sshll.u32 %s296_s17, 4  ;;  %s221_s18 = int_to_ptr.vmem [resolvable:$true] %s220_s18 }
   0x8   :  { %33 = vperm.xlu0 %253, %v27_v5   ;;  %43 = vperm.xlu1 %254, %v29_v6   ;;  %v176_v13 = vld [vmem:[%s384_s3 + $0x18] sm:$0xff]  ;;  %s271_s19 = scalar_lea.vmem %s221_s18, 16  ;;  %s275_s20 = scalar_lea.vmem %s221_s18, 32 }
   0x9   :  { %p272_p0 = scmp.ne.s32.totalorder %s221_s18, %s271_s19  ;;  %p276_p1 = scmp.lt.s32.totalorder %s221_s18, %s221_s18 }
   0xa   :  { %p277_p2 = scmp.lt.s32.totalorder %s275_s20, %s271_s19 }
   0xc   :  { %38 = vperm.xlu0 %253, %v28_v8   ;;  %48 = vperm.xlu1 %254, %v30_v9   ;;  %p278_p3 = por %p277_p2, %p276_p1 }
   0xe   :  { %p279_p4 = pnand %p278_p3, %p272_p0 }
  0x10   :  { %179 = vperm.xlu0 %253, %v173_v10   ;;  %184 = vperm.xlu1 %254, %v174_v11  }
  0x14   :  { %189 = vperm.xlu0 %253, %v175_v12   ;;  %194 = vperm.xlu1 %254, %v176_v13  }
  0x87   :  { %v34_v14 = vpop.permute.xlu0 %33  ;;  %v44_v15 = vpop.permute.xlu1 %43 }
  0x8b   :  { %v39_v16 = vpop.permute.xlu0 %38  ;;  %v49_v17 = vpop.permute.xlu1 %48 }
  0x8f   :  { %v180_v38 = vpop.permute.xlu0 %179  ;;  %v185_v40 = vpop.permute.xlu1 %184 }
  0x93   :  { %v190_v46 = vpop.permute.xlu0 %189  ;;  %v195_v49 = vpop.permute.xlu1 %194 }
  0xd8   :  { %v245_v18 = vpop.f32.mrb[0].mxu0  ;;  %v248_v19 = vpop.f32.mrb[0].mxu1 }
  0xd9   :  { %v136_v20 = vadd.f32 %v245_v18, %v39_v16  ;;  %v146_v21 = vadd.f32 %v248_v19, %v49_v17  ;;  %v130_v22 = vpop.f32.mrb[1].mxu0  ;;  %v140_v23 = vpop.f32.mrb[1].mxu1 }
  0xda   :  { %v131_v24 = vadd.f32 %v130_v22, %v34_v14  ;;  %v141_v25 = vadd.f32 %v140_v23, %v44_v15 }
  0xdb   :  { %v233_v26 = vmul.f32 -1.442695, %v136_v20  ;;  %v235_v27 = vmul.f32 -1.442695, %v146_v21 }
  0xdc   :  { %v232_v28 = vmul.f32 -1.442695, %v131_v24  ;;  %v234_v29 = vmul.f32 -1.442695, %v141_v25 }
  0xdd   :  { %255 = vpow2.f32 %v233_v26 }
  0xde   :  { %257 = vpow2.f32 %v235_v27 }
  0xdf   :  { %259 = vpow2.f32 %v232_v28 }
  0xe0   :  { %261 = vpow2.f32 %v234_v29 }
  0xe7   :  { %v256_v30 = vpop.eup %255 }
  0xe8   :  { %v258_v31 = vpop.eup %257  ;;  %v162_v32 = vadd.f32 1.0, %v256_v30 }
  0xe9   :  { %v260_v33 = vpop.eup %259  ;;  %v164_v35 = vadd.f32 1.0, %v258_v31 }
  0xea   :  { %v262_v34 = vpop.eup %261  ;;  %263 = vrcp.f32 %v162_v32  ;;  %v161_v36 = vadd.f32 1.0, %v260_v33 }
  0xeb   :  { %v163_v37 = vadd.f32 1.0, %v262_v34 }
  0xec   :  { %265 = vrcp.f32 %v161_v36 }
  0xed   :  { %267 = vrcp.f32 %v163_v37 }
  0xee   :  { %269 = vrcp.f32 %v164_v35 }
  0xf4   :  { %v264_v39 = vpop.eup %263 }
  0xf5   :  { %v198_v41 = vmul.f32 %v264_v39, %v185_v40 }
  0xf6   :  { %v266_v42 = vpop.eup %265 }
  0xf7   :  { %v268_v43 = vpop.eup %267  ;;  %v197_v44 = vmul.f32 %v266_v42, %v180_v38 }
  0xf8   :  { %v270_v45 = vpop.eup %269  ;;  %v199_v47 = vmul.f32 %v268_v43, %v190_v46 }
  0xf9   :  { %v201_v48 = vadd.f32 %v198_v41, %v197_v44  ;;  %v200_v50 = vmul.f32 %v270_v45, %v195_v49 }
  0xfb   :  { %v202_v51 = vadd.f32 %v201_v48, %v199_v47 }
  0xfd   :  { %v203_v52 = vadd.f32 %v202_v51, %v200_v50 }
  0xff   :  { %v204_v53 = vrot.slane %v203_v52, 4 }
 0x101   :  { %v205_v54 = vadd.f32 %v204_v53, %v203_v52 }
 0x103   :  { %v206_v55 = vrot.slane %v205_v54, 2 }
 0x105   :  { %v207_v56 = vadd.f32 %v206_v55, %v205_v54 }
 0x107   :  { %v208_v57 = vrot.slane %v207_v56, 1 }
 0x109   :  { %v209_v59 = vadd.f32 %v208_v57, %v207_v56 }
 0x10b   :  { %v212_v60 = vadd.f32 %v211_v58, %v209_v59 }
 0x10d   :  { %213 = vst [vmem:[#allocation3] sm:$0x1] %v212_v60 }
 0x10e   :  { %282 = shalt.err (!%p279_p4)
}
 0x10f   :  { %s283_s23 = scalar_lea.hbm %s386_s5, 16 }
 0x110   :  { %p284_p5 = scmp.ne.s32.totalorder %s386_s5, %s283_s23  ;;  %p287_p6 = scmp.lt.u32.totalorder %s283_s23, %s386_s5 }
 0x112   :  { %p289_p7 = pnand %p287_p6, %p284_p5 }
 0x114   :  { %292 = shalt.err (!%p289_p7)
}
 0x115   :  { %223 = dma.vmem_to_hbm [thread:$0]  %s221_s18, 16, %s386_s5, [#allocation4]  }
 0x116   :  { %293 = dma.done.wait [#allocation4], 16  }
 0x117   :  { %294 = vsyncadd [#allocation4], 4294967280 }
 0x118   :  { %227 = vsyncpa [#allocation4], 1 }

</bundles_post_ra>
